<compile_context>
chip_gen: v7x
topology: tpu7x:2x2x1
jax: 0.10.0
libtpu: 0.0.40
codegen_flags: <defaults>
</compile_context>

<pallas_src>
import jax
import jax.numpy as jnp
from jax.experimental import pallas as pl
from jax.experimental.pallas import tpu as pltpu


def _no_answer_kernel(ce_ref, start_full_ref, end_full_ref,
                      start_seg_ref, end_seg_ref,
                      w_attn_ref, b_attn_ref,
                      w1a_ref, w1b_ref, w1c_ref, b1_ref,
                      w2_ref, b2_ref,
                      out_ref, acc_ref):
    t = pl.program_id(1)
    n_t = pl.num_programs(1)
    bt, tt, d = ce_ref.shape

    @pl.when(t == 0)
    def _():
        acc_ref[...] = jnp.zeros_like(acc_ref)

    ce = ce_ref[...]                                        # [Bt, Tt, D], input dtype

    # Softmax over the full sequence; only the current T-segment is materialized.
    def softmax_seg(full_ref, seg_ref):
        full = full_ref[...].astype(jnp.float32)            # [Bt, T]
        m = jnp.max(full, axis=-1, keepdims=True)
        denom = jnp.sum(jnp.exp(full - m), axis=-1, keepdims=True)
        inv = pl.reciprocal(denom, approx=True)             # EUP slot, ~free
        seg = seg_ref[...].astype(jnp.float32)              # [Bt, Tt]
        return jnp.exp(seg - m) * inv                       # [Bt, Tt]

    p1 = softmax_seg(start_full_ref, start_seg_ref)
    p2 = softmax_seg(end_full_ref, end_seg_ref)

    # p_3_h: self_attn Linear(D, 1) per token (NO softmax, as in PyTorch),
    # computed on the MXU: [Bt,1,D] x [Bt,Tt,D] -> [Bt,1,Tt].
    w_row = jnp.broadcast_to(w_attn_ref[...][None, :, :], (bt, 1, d)).astype(ce.dtype)
    p3 = (jnp.einsum('bod,btd->bot', w_row, ce,
                     preferred_element_type=jnp.float32)
          + b_attn_ref[0])                                  # [Bt, 1, Tt]

    # Stack p1/p2/p3 -> [Bt, 3, Tt] and do ONE batched MXU contraction over Tt,
    # accumulating the partial [Bt, 3, D] pooled vectors across T tiles.
    p_stack = jnp.concatenate([p1[:, None, :], p2[:, None, :], p3], axis=1)
    acc_ref[...] += jnp.einsum('bpt,btd->bpd', p_stack.astype(ce.dtype), ce,
                               preferred_element_type=jnp.float32)

    # Finalize: 2-layer bias MLP on the pooled vectors (weights pre-transposed).
    @pl.when(t == n_t - 1)
    def _():
        acc = acc_ref[...]                                  # [Bt, 3, D] f32
        v1 = acc[:, 0, :]
        v2 = acc[:, 1, :]
        v3 = acc[:, 2, :]
        h = (jnp.dot(v1, w1a_ref[...], preferred_element_type=jnp.float32)
             + jnp.dot(v2, w1b_ref[...], preferred_element_type=jnp.float32)
             + jnp.dot(v3, w1c_ref[...], preferred_element_type=jnp.float32)
             + b1_ref[...])                                 # [Bt, H]
        h = jnp.maximum(h, 0.0)                             # ReLU
        out = jnp.dot(h, w2_ref[...], preferred_element_type=jnp.float32) + b2_ref[0]
        out_ref[...] = out.astype(out_ref.dtype)            # [Bt, 1]


def _pick_t_tile(T, target):
    """Largest T tile <= target that divides T and is a multiple of 128 (else T)."""
    if T <= target:
        return T
    cand = (min(target, T) // 128) * 128
    while cand >= 128:
        if T % cand == 0:
            return cand
        cand -= 128
    return T


def no_answer_forward(context_embed, span_start_logits, span_end_logits, params,
                      *, t_tile_target=512):
    B, T, D = context_embed.shape
    H = params["w1"].shape[0]
    itemsize = jnp.dtype(context_embed.dtype).itemsize

    # Tile sizing: keep double-buffered ce tiles well under the smallest VMEM
    # generation (v7x: 64 MiB physical / 32 MiB scoped default).
    b_tile = 8 if (B % 8 == 0) else B
    budget = 24 << 20
    max_t = max(128, budget // max(1, 2 * b_tile * D * itemsize))
    t_tile = _pick_t_tile(T, min(t_tile_target, max_t))
    grid = (B // b_tile, T // t_tile)

    # Trace-time (free) weight preprocessing: pre-transpose so the kernel never
    # transposes; split w1 into its three D-wide chunks (== concat in the ref).
    w1_t = params["w1"].T                                   # [3D, H]
    w1a_t = w1_t[0 * D:1 * D]
    w1b_t = w1_t[1 * D:2 * D]
    w1c_t = w1_t[2 * D:3 * D]
    w2_t = params["w2"].T                                   # [H, 1]
    w_attn = params["w_attn"]                               # [1, D]
    b1 = params["b1"].reshape(1, H)
    b_attn = params["b_attn"].reshape(1).astype(jnp.float32)
    b2 = params["b2"].reshape(1).astype(jnp.float32)

    def full2(shape):
        return pl.BlockSpec(shape, lambda b, t: (0, 0))

    smem_spec = pl.BlockSpec(memory_space=pltpu.MemorySpace.SMEM)

    in_specs = [
        pl.BlockSpec((b_tile, t_tile, D), lambda b, t: (b, t, 0)),   # ce tile
        pl.BlockSpec((b_tile, T), lambda b, t: (b, 0)),              # start logits (full rows)
        pl.BlockSpec((b_tile, T), lambda b, t: (b, 0)),              # end   logits (full rows)
        pl.BlockSpec((b_tile, t_tile), lambda b, t: (b, t)),         # start logits (T segment)
        pl.BlockSpec((b_tile, t_tile), lambda b, t: (b, t)),         # end   logits (T segment)
        full2((1, D)),                                               # w_attn
        smem_spec,                                                   # b_attn (SMEM scalar)
        full2((D, H)), full2((D, H)), full2((D, H)),                 # w1a/b/c (pre-transposed)
        full2((1, H)),                                               # b1
        full2((H, 1)),                                               # w2 (pre-transposed)
        smem_spec,                                                   # b2 (SMEM scalar)
    ]
    out_specs = pl.BlockSpec((b_tile, 1), lambda b, t: (b, 0))

    tile_bytes = b_tile * t_tile * D * itemsize
    aux_bytes = (2 * b_tile * (T + t_tile) * itemsize          # logits blocks
                 + (D + 3 * D * H + 2 * H) * 4                 # weights / biases
                 + b_tile * 3 * D * 4                          # accumulator
                 + b_tile * 4)                                 # output
    vmem_limit = int(min(max(3 * tile_bytes + 2 * aux_bytes + (2 << 20), 16 << 20),
                         40 << 20))

    return pl.pallas_call(
        _no_answer_kernel,
        out_shape=jax.ShapeDtypeStruct((B, 1), jnp.float32),
        grid=grid,
        in_specs=in_specs,
        out_specs=out_specs,
        scratch_shapes=[pltpu.VMEM((b_tile, 3, D), jnp.float32)],
        compiler_params=pltpu.CompilerParams(
            dimension_semantics=("parallel", "arbitrary"),
            vmem_limit_bytes=vmem_limit),
    )(context_embed,
      span_start_logits, span_end_logits,
      span_start_logits, span_end_logits,
      w_attn, b_attn,
      w1a_t, w1b_t, w1c_t, b1,
      w2_t, b2)


def no_answer_reference(context_embed, span_start_logits, span_end_logits, params):
    """Pure-JAX reference mirroring the PyTorch forward exactly."""
    p1 = jax.nn.softmax(span_start_logits, -1)[:, None, :]                 # [B,1,T]
    p2 = jax.nn.softmax(span_end_logits, -1)[:, None, :]                   # [B,1,T]
    p3 = (jnp.einsum('btd,od->bto', context_embed, params["w_attn"])
          + params["b_attn"]).transpose(0, 2, 1)                           # [B,1,T]
    v1 = p1 @ context_embed                                                # [B,1,D]
    v2 = p2 @ context_embed
    v3 = p3 @ context_embed
    v = jnp.concatenate([v1, v2, v3], axis=-1)                             # [B,1,3D]
    h = jax.nn.relu(v @ params["w1"].T + params["b1"])                     # [B,1,H]
    out = h @ params["w2"].T + params["b2"]                                # [B,1,1]
    return out[..., 0]                                                     # [B,1]


def init_params(key, embed_dim, bias_hidden_dim):
    ks = jax.random.split(key, 6)
    scale = 0.1
    return {
        # nn.Linear(embed_dim, 1): weight [1, D], bias [1]
        "w_attn": scale * jax.random.normal(ks[0], (1, embed_dim), jnp.float32),
        "b_attn": scale * jax.random.normal(ks[1], (1,), jnp.float32),
        # nn.Linear(3D, H): weight [H, 3D], bias [H]
        "w1": scale * jax.random.normal(ks[2], (bias_hidden_dim, 3 * embed_dim), jnp.float32),
        "b1": scale * jax.random.normal(ks[3], (bias_hidden_dim,), jnp.float32),
        # nn.Linear(H, 1): weight [1, H], bias [1]
        "w2": scale * jax.random.normal(ks[4], (1, bias_hidden_dim), jnp.float32),
        "b2": scale * jax.random.normal(ks[5], (1,), jnp.float32),
    }


if __name__ == "__main__":
    B, T, D, H = 2, 256, 32, 16

    key = jax.random.PRNGKey(0)
    k_ce, k_s, k_e, k_p = jax.random.split(key, 4)

    context_embed = jax.random.normal(k_ce, (B, T, D), jnp.float32)
    span_start_logits = jax.random.normal(k_s, (B, T), jnp.float32)
    span_end_logits = jax.random.normal(k_e, (B, T), jnp.float32)
    params = init_params(k_p, D, H)

    # t_tile_target=128 -> grid=(1, 2): exercises the T-tiled accumulator path.
    out = no_answer_forward(context_embed, span_start_logits, span_end_logits,
                            params, t_tile_target=128)
    out = jax.block_until_ready(out)

    ref = no_answer_reference(context_embed, span_start_logits, span_end_logits, params)
    assert out.shape == (B, 1), out.shape
    # Slightly loose tolerance: softmax denominator uses the EUP approximate reciprocal.
    assert jnp.allclose(out, ref, rtol=2e-3, atol=2e-3), (out, ref)

    print("KERNEL_OK")
</pallas_src>

<mosaic_0001>
module attributes {stable_mosaic.version = 11 : i64} {
  func.func @_no_answer_kernel(%arg0: i32, %arg1: i32, %arg2: memref<2x128x32xf32, #tpu.memory_space<vmem>>, %arg3: memref<2x256xf32, #tpu.memory_space<vmem>>, %arg4: memref<2x256xf32, #tpu.memory_space<vmem>>, %arg5: memref<2x128xf32, #tpu.memory_space<vmem>>, %arg6: memref<2x128xf32, #tpu.memory_space<vmem>>, %arg7: memref<1x32xf32, #tpu.memory_space<vmem>>, %arg8: memref<1xf32, #tpu.memory_space<smem>>, %arg9: memref<32x16xf32, #tpu.memory_space<vmem>>, %arg10: memref<32x16xf32, #tpu.memory_space<vmem>>, %arg11: memref<32x16xf32, #tpu.memory_space<vmem>>, %arg12: memref<1x16xf32, #tpu.memory_space<vmem>>, %arg13: memref<16x1xf32, #tpu.memory_space<vmem>>, %arg14: memref<1xf32, #tpu.memory_space<smem>>, %arg15: memref<2x1xf32, #tpu.memory_space<vmem>>, %arg16: memref<2x3x32xf32, #tpu.memory_space<vmem>>) attributes {dimension_semantics = [#tpu.dimension_semantics<parallel>, #tpu.dimension_semantics<arbitrary>], iteration_bounds = array<i64: 1, 2>, scalar_prefetch = 0 : i64, scratch_operands = 1 : i64, tpu.core_type = #tpu.core_type<tc>, window_params = [{transform_indices = @transform_0, window_bounds = array<i64: 2, 128, 32>}, {transform_indices = @transform_1, window_bounds = array<i64: 2, 256>}, {transform_indices = @transform_2, window_bounds = array<i64: 2, 256>}, {transform_indices = @transform_3, window_bounds = array<i64: 2, 128>}, {transform_indices = @transform_4, window_bounds = array<i64: 2, 128>}, {pipeline_mode = #tpu.pipeline_mode<synchronous>, transform_indices = @transform_5, window_bounds = array<i64: 1, 32>}, {transform_indices = @transform_6, window_bounds = array<i64: 1>}, {pipeline_mode = #tpu.pipeline_mode<synchronous>, transform_indices = @transform_7, window_bounds = array<i64: 32, 16>}, {pipeline_mode = #tpu.pipeline_mode<synchronous>, transform_indices = @transform_8, window_bounds = array<i64: 32, 16>}, {pipeline_mode = #tpu.pipeline_mode<synchronous>, transform_indices = @transform_9, window_bounds = array<i64: 32, 16>}, {pipeline_mode = #tpu.pipeline_mode<synchronous>, transform_indices = @transform_10, window_bounds = array<i64: 1, 16>}, {pipeline_mode = #tpu.pipeline_mode<synchronous>, transform_indices = @transform_11, window_bounds = array<i64: 16, 1>}, {transform_indices = @transform_12, window_bounds = array<i64: 1>}, {transform_indices = @transform_13, window_bounds = array<i64: 2, 1>}]} {
    %c0_i32 = arith.constant 0 : i32
    %0 = arith.cmpi eq, %arg1, %c0_i32 : i32
    %1 = arith.extui %0 : i1 to i32
    %c0_i32_0 = arith.constant 0 : i32
    %2 = arith.cmpi ne, %1, %c0_i32_0 : i32
    scf.if %2 {
      %cst_26 = arith.constant 0.000000e+00 : f32
      %52 = vector.broadcast %cst_26 : f32 to vector<2x3x32xf32>
      %c0_27 = arith.constant 0 : index
      %c0_28 = arith.constant 0 : index
      %c0_29 = arith.constant 0 : index
      %53 = vector.load %arg16[%c0_27, %c0_28, %c0_29] : memref<2x3x32xf32, #tpu.memory_space<vmem>>, vector<2x3x32xf32>
      tpu.vector_store %arg16[%c0_27, %c0_28, %c0_29], %52 {strides = array<i32>} : memref<2x3x32xf32, #tpu.memory_space<vmem>>, vector<2x3x32xf32>,
    } else {
    }
    %c0 = arith.constant 0 : index
    %c0_1 = arith.constant 0 : index
    %c0_2 = arith.constant 0 : index
    %3 = vector.load %arg2[%c0, %c0_1, %c0_2] : memref<2x128x32xf32, #tpu.memory_space<vmem>>, vector<2x128x32xf32>
    %c0_3 = arith.constant 0 : index
    %c0_4 = arith.constant 0 : index
    %4 = vector.load %arg3[%c0_3, %c0_4] : memref<2x256xf32, #tpu.memory_space<vmem>>, vector<2x256xf32>
    %cst = arith.constant dense<0xFF800000> : vector<2xf32>
    %5 = vector.multi_reduction <maximumf>, %4, %cst [1] : vector<2x256xf32> to vector<2xf32>
    %6 = vector.shape_cast %5 : vector<2xf32> to vector<2x1xf32>
    %7 = vector.broadcast %6 : vector<2x1xf32> to vector<2x256xf32>
    %8 = arith.subf %4, %7 : vector<2x256xf32>
    %9 = math.exp %8 : vector<2x256xf32>
    %cst_5 = arith.constant dense<0.000000e+00> : vector<2xf32>
    %10 = vector.multi_reduction <add>, %9, %cst_5 [1] : vector<2x256xf32> to vector<2xf32>
    %11 = vector.shape_cast %10 : vector<2xf32> to vector<2x1xf32>
    %12 = tpu.reciprocal %11 {approx = true} : vector<2x1xf32> -> vector<2x1xf32>
    %c0_6 = arith.constant 0 : index
    %c0_7 = arith.constant 0 : index
    %13 = vector.load %arg5[%c0_6, %c0_7] : memref<2x128xf32, #tpu.memory_space<vmem>>, vector<2x128xf32>
    %14 = vector.broadcast %6 : vector<2x1xf32> to vector<2x128xf32>
    %15 = arith.subf %13, %14 : vector<2x128xf32>
    %16 = math.exp %15 : vector<2x128xf32>
    %17 = vector.broadcast %12 : vector<2x1xf32> to vector<2x128xf32>
    %18 = arith.mulf %16, %17 : vector<2x128xf32>
    %c0_8 = arith.constant 0 : index
    %c0_9 = arith.constant 0 : index
    %19 = vector.load %arg4[%c0_8, %c0_9] : memref<2x256xf32, #tpu.memory_space<vmem>>, vector<2x256xf32>
    %cst_10 = arith.constant dense<0xFF800000> : vector<2xf32>
    %20 = vector.multi_reduction <maximumf>, %19, %cst_10 [1] : vector<2x256xf32> to vector<2xf32>
    %21 = vector.shape_cast %20 : vector<2xf32> to vector<2x1xf32>
    %22 = vector.broadcast %21 : vector<2x1xf32> to vector<2x256xf32>
    %23 = arith.subf %19, %22 : vector<2x256xf32>
    %24 = math.exp %23 : vector<2x256xf32>
    %cst_11 = arith.constant dense<0.000000e+00> : vector<2xf32>
    %25 = vector.multi_reduction <add>, %24, %cst_11 [1] : vector<2x256xf32> to vector<2xf32>
    %26 = vector.shape_cast %25 : vector<2xf32> to vector<2x1xf32>
    %27 = tpu.reciprocal %26 {approx = true} : vector<2x1xf32> -> vector<2x1xf32>
    %c0_12 = arith.constant 0 : index
    %c0_13 = arith.constant 0 : index
    %28 = vector.load %arg6[%c0_12, %c0_13] : memref<2x128xf32, #tpu.memory_space<vmem>>, vector<2x128xf32>
    %29 = vector.broadcast %21 : vector<2x1xf32> to vector<2x128xf32>
    %30 = arith.subf %28, %29 : vector<2x128xf32>
    %31 = math.exp %30 : vector<2x128xf32>
    %32 = vector.broadcast %27 : vector<2x1xf32> to vector<2x128xf32>
    %33 = arith.mulf %31, %32 : vector<2x128xf32>
    %c0_14 = arith.constant 0 : index
    %c0_15 = arith.constant 0 : index
    %34 = vector.load %arg7[%c0_14, %c0_15] : memref<1x32xf32, #tpu.memory_space<vmem>>, vector<1x32xf32>
    %35 = vector.shape_cast %34 : vector<1x32xf32> to vector<1x1x32xf32>
    %36 = vector.shape_cast %35 : vector<1x1x32xf32> to vector<1x1x32xf32>
    %37 = vector.broadcast %36 : vector<1x1x32xf32> to vector<2x1x32xf32>
    "tpu.trace_start"() <{level = 10 : i32, message = "bod,btd->bot"}> : () -> ()
    %cst_16 = arith.constant dense<0.000000e+00> : vector<2x1x128xf32>
    %38 = tpu.matmul %37, %3, %cst_16 {dimension_numbers = #tpu.dot_dimension_numbers<[2], [2], [1], [1], [0, 0, 0, 1, 1, 1], [0], [0]>} : vector<2x1x32xf32>, vector<2x128x32xf32>, vector<2x1x128xf32> -> vector<2x1x128xf32>
    "tpu.trace_stop"() : () -> ()
    %c0_17 = arith.constant 0 : index
    %39 = memref.load %arg8[%c0_17] : memref<1xf32, #tpu.memory_space<smem>>
    %40 = vector.broadcast %39 : f32 to vector<2x1x128xf32>
    %41 = arith.addf %38, %40 : vector<2x1x128xf32>
    %42 = vector.shape_cast %18 : vector<2x128xf32> to vector<2x1x128xf32>
    %43 = vector.shape_cast %33 : vector<2x128xf32> to vector<2x1x128xf32>
    %44 = tpu.concatenate %42, %43, %41 in 1 : vector<2x1x128xf32>, vector<2x1x128xf32>, vector<2x1x128xf32> -> vector<2x3x128xf32>
    %c0_18 = arith.constant 0 : index
    %c0_19 = arith.constant 0 : index
    %c0_20 = arith.constant 0 : index
    %45 = vector.load %arg16[%c0_18, %c0_19, %c0_20] : memref<2x3x32xf32, #tpu.memory_space<vmem>>, vector<2x3x32xf32>
    "tpu.trace_start"() <{level = 10 : i32, message = "bpt,btd->bpd"}> : () -> ()
    %cst_21 = arith.constant dense<0.000000e+00> : vector<2x3x32xf32>
    %46 = tpu.matmul %44, %3, %cst_21 {dimension_numbers = #tpu.dot_dimension_numbers<[2], [1], [1], [2], [0, 0, 0, 1, 1, 2], [0], [0]>} : vector<2x3x128xf32>, vector<2x128x32xf32>, vector<2x3x32xf32> -> vector<2x3x32xf32>
    "tpu.trace_stop"() : () -> ()
    %47 = arith.addf %45, %46 : vector<2x3x32xf32>
    %c0_22 = arith.constant 0 : index
    %c0_23 = arith.constant 0 : index
    %c0_24 = arith.constant 0 : index
    %48 = vector.load %arg16[%c0_22, %c0_23, %c0_24] : memref<2x3x32xf32, #tpu.memory_space<vmem>>, vector<2x3x32xf32>
    tpu.vector_store %arg16[%c0_22, %c0_23, %c0_24], %47 {strides = array<i32>} : memref<2x3x32xf32, #tpu.memory_space<vmem>>, vector<2x3x32xf32>,
    %c1_i32 = arith.constant 1 : i32
    %49 = arith.cmpi eq, %arg1, %c1_i32 : i32
    %50 = arith.extui %49 : i1 to i32
    %c0_i32_25 = arith.constant 0 : i32
    %51 = arith.cmpi ne, %50, %c0_i32_25 : i32
    scf.if %51 {
      %c0_26 = arith.constant 0 : index
      %c0_27 = arith.constant 0 : index
      %c0_28 = arith.constant 0 : index
      %52 = vector.load %arg16[%c0_26, %c0_27, %c0_28] : memref<2x3x32xf32, #tpu.memory_space<vmem>>, vector<2x3x32xf32>
      %53 = vector.extract_strided_slice %52 {offsets = [0, 0, 0], sizes = [2, 1, 32], strides = [1, 1, 1]} : vector<2x3x32xf32> to vector<2x1x32xf32>
      %54 = vector.shape_cast %53 : vector<2x1x32xf32> to vector<2x32xf32>
      %55 = vector.extract_strided_slice %52 {offsets = [0, 1, 0], sizes = [2, 1, 32], strides = [1, 1, 1]} : vector<2x3x32xf32> to vector<2x1x32xf32>
      %56 = vector.shape_cast %55 : vector<2x1x32xf32> to vector<2x32xf32>
      %57 = vector.extract_strided_slice %52 {offsets = [0, 2, 0], sizes = [2, 1, 32], strides = [1, 1, 1]} : vector<2x3x32xf32> to vector<2x1x32xf32>
      %58 = vector.shape_cast %57 : vector<2x1x32xf32> to vector<2x32xf32>
      %c0_29 = arith.constant 0 : index
      %c0_30 = arith.constant 0 : index
      %59 = vector.load %arg9[%c0_29, %c0_30] : memref<32x16xf32, #tpu.memory_space<vmem>>, vector<32x16xf32>
      %cst_31 = arith.constant dense<0.000000e+00> : vector<2x16xf32>
      %60 = tpu.matmul %54, %59, %cst_31 {dimension_numbers = #tpu.dot_dimension_numbers<[1], [0], [0], [1], [0, 0, 1, 1], [], []>} : vector<2x32xf32>, vector<32x16xf32>, vector<2x16xf32> -> vector<2x16xf32>
      %c0_32 = arith.constant 0 : index
      %c0_33 = arith.constant 0 : index
      %61 = vector.load %arg10[%c0_32, %c0_33] : memref<32x16xf32, #tpu.memory_space<vmem>>, vector<32x16xf32>
      %cst_34 = arith.constant dense<0.000000e+00> : vector<2x16xf32>
      %62 = tpu.matmul %56, %61, %cst_34 {dimension_numbers = #tpu.dot_dimension_numbers<[1], [0], [0], [1], [0, 0, 1, 1], [], []>} : vector<2x32xf32>, vector<32x16xf32>, vector<2x16xf32> -> vector<2x16xf32>
      %63 = arith.addf %60, %62 : vector<2x16xf32>
      %c0_35 = arith.constant 0 : index
      %c0_36 = arith.constant 0 : index
      %64 = vector.load %arg11[%c0_35, %c0_36] : memref<32x16xf32, #tpu.memory_space<vmem>>, vector<32x16xf32>
      %cst_37 = arith.constant dense<0.000000e+00> : vector<2x16xf32>
      %65 = tpu.matmul %58, %64, %cst_37 {dimension_numbers = #tpu.dot_dimension_numbers<[1], [0], [0], [1], [0, 0, 1, 1], [], []>} : vector<2x32xf32>, vector<32x16xf32>, vector<2x16xf32> -> vector<2x16xf32>
      %66 = arith.addf %63, %65 : vector<2x16xf32>
      %c0_38 = arith.constant 0 : index
      %c0_39 = arith.constant 0 : index
      %67 = vector.load %arg12[%c0_38, %c0_39] : memref<1x16xf32, #tpu.memory_space<vmem>>, vector<1x16xf32>
      %68 = vector.broadcast %67 : vector<1x16xf32> to vector<2x16xf32>
      %69 = arith.addf %66, %68 : vector<2x16xf32>
      %cst_40 = arith.constant 0.000000e+00 : f32
      %70 = vector.broadcast %cst_40 : f32 to vector<2x16xf32>
      %71 = arith.maximumf %69, %70 : vector<2x16xf32>
      %c0_41 = arith.constant 0 : index
      %c0_42 = arith.constant 0 : index
      %72 = vector.load %arg13[%c0_41, %c0_42] : memref<16x1xf32, #tpu.memory_space<vmem>>, vector<16x1xf32>
      %cst_43 = arith.constant dense<0.000000e+00> : vector<2x1xf32>
      %73 = tpu.matmul %71, %72, %cst_43 {dimension_numbers = #tpu.dot_dimension_numbers<[1], [0], [0], [1], [0, 0, 1, 1], [], []>} : vector<2x16xf32>, vector<16x1xf32>, vector<2x1xf32> -> vector<2x1xf32>
      %c0_44 = arith.constant 0 : index
      %74 = memref.load %arg14[%c0_44] : memref<1xf32, #tpu.memory_space<smem>>
      %75 = vector.broadcast %74 : f32 to vector<2x1xf32>
      %76 = arith.addf %73, %75 : vector<2x1xf32>
      %c0_45 = arith.constant 0 : index
      %c0_46 = arith.constant 0 : index
      %77 = vector.load %arg15[%c0_45, %c0_46] : memref<2x1xf32, #tpu.memory_space<vmem>>, vector<2x1xf32>
      tpu.vector_store %arg15[%c0_45, %c0_46], %76 {strides = array<i32>} : memref<2x1xf32, #tpu.memory_space<vmem>>, vector<2x1xf32>,
    } else {
    }
    return
  }
  func.func @transform_0(%arg0: i32, %arg1: i32) -> (i32, i32, i32) {
    %c0_i32 = arith.constant 0 : i32
    %c0_i32_0 = arith.constant 0 : i32
    return %arg0, %arg1, %c0_i32 : i32, i32, i32
  }
  func.func @transform_1(%arg0: i32, %arg1: i32) -> (i32, i32) {
    %c0_i32 = arith.constant 0 : i32
    %c0_i32_0 = arith.constant 0 : i32
    return %arg0, %c0_i32 : i32, i32
  }
  func.func @transform_2(%arg0: i32, %arg1: i32) -> (i32, i32) {
    %c0_i32 = arith.constant 0 : i32
    %c0_i32_0 = arith.constant 0 : i32
    return %arg0, %c0_i32 : i32, i32
  }
  func.func @transform_3(%arg0: i32, %arg1: i32) -> (i32, i32) {
    %c0_i32 = arith.constant 0 : i32
    return %arg0, %arg1 : i32, i32
  }
  func.func @transform_4(%arg0: i32, %arg1: i32) -> (i32, i32) {
    %c0_i32 = arith.constant 0 : i32
    return %arg0, %arg1 : i32, i32
  }
  func.func @transform_5(%arg0: i32, %arg1: i32) -> (i32, i32) {
    %c0_i32 = arith.constant 0 : i32
    %c0_i32_0 = arith.constant 0 : i32
    %c0_i32_1 = arith.constant 0 : i32
    return %c0_i32, %c0_i32_0 : i32, i32
  }
  func.func @transform_6(%arg0: i32, %arg1: i32) -> i32 {
    %c0_i32 = arith.constant 0 : i32
    %c0_i32_0 = arith.constant 0 : i32
    return %c0_i32 : i32
  }
  func.func @transform_7(%arg0: i32, %arg1: i32) -> (i32, i32) {
    %c0_i32 = arith.constant 0 : i32
    %c0_i32_0 = arith.constant 0 : i32
    %c0_i32_1 = arith.constant 0 : i32
    return %c0_i32, %c0_i32_0 : i32, i32
  }
  func.func @transform_8(%arg0: i32, %arg1: i32) -> (i32, i32) {
    %c0_i32 = arith.constant 0 : i32
    %c0_i32_0 = arith.constant 0 : i32
    %c0_i32_1 = arith.constant 0 : i32
    return %c0_i32, %c0_i32_0 : i32, i32
  }
  func.func @transform_9(%arg0: i32, %arg1: i32) -> (i32, i32) {
    %c0_i32 = arith.constant 0 : i32
    %c0_i32_0 = arith.constant 0 : i32
    %c0_i32_1 = arith.constant 0 : i32
    return %c0_i32, %c0_i32_0 : i32, i32
  }
  func.func @transform_10(%arg0: i32, %arg1: i32) -> (i32, i32) {
    %c0_i32 = arith.constant 0 : i32
    %c0_i32_0 = arith.constant 0 : i32
    %c0_i32_1 = arith.constant 0 : i32
    return %c0_i32, %c0_i32_0 : i32, i32
  }
  func.func @transform_11(%arg0: i32, %arg1: i32) -> (i32, i32) {
    %c0_i32 = arith.constant 0 : i32
    %c0_i32_0 = arith.constant 0 : i32
    %c0_i32_1 = arith.constant 0 : i32
    return %c0_i32, %c0_i32_0 : i32, i32
  }
  func.func @transform_12(%arg0: i32, %arg1: i32) -> i32 {
    %c0_i32 = arith.constant 0 : i32
    %c0_i32_0 = arith.constant 0 : i32
    return %c0_i32 : i32
  }
  func.func @transform_13(%arg0: i32, %arg1: i32) -> (i32, i32) {
    %c0_i32 = arith.constant 0 : i32
    %c0_i32_0 = arith.constant 0 : i32
    return %arg0, %c0_i32 : i32, i32
  }
}

</mosaic_0001>

<bundles_post_ra>
// kernel: tpu_custom_call.1
= control target key start
LH: loop header
LB: loop body
LE: loop exit
PB: predicated region body
PF: predicated region fallthrough
CT: control target
= control target key end

     0   :  { %s2814_s0 = inlined_call_operand.vmem [shape: f32[2,256,32], index: 0, kind: input, shape index: {}]   ;;  %s2815_s1 = inlined_call_operand.vmem [shape: f32[2,256], index: 1, kind: input, shape index: {}]   ;;  %s2816_s2 = inlined_call_operand.vmem [shape: f32[2,256], index: 2, kind: input, shape index: {}]   ;;  %s2817_s3 = inlined_call_operand.vmem [shape: f32[2,256], index: 3, kind: input, shape index: {}]   ;;  %s2818_s4 = inlined_call_operand.vmem [shape: f32[2,256], index: 4, kind: input, shape index: {}]   ;;  %s2819_s5 = inlined_call_operand.vmem [shape: f32[1,32], index: 5, kind: input, shape index: {}]   ;;  %s2820_s6 = inlined_call_operand.<no memory space> [shape: f32[1], index: 6, kind: input, shape index: {}]   ;;  %s2821_s7 = inlined_call_operand.vmem [shape: f32[32,16], index: 7, kind: input, shape index: {}]   ;;  %s2822_s8 = inlined_call_operand.vmem [shape: f32[32,16], index: 8, kind: input, shape index: {}]   ;;  %s2823_s9 = inlined_call_operand.vmem [shape: f32[32,16], index: 9, kind: input, shape index: {}]   ;;  %s2824_s10 = inlined_call_operand.vmem [shape: f32[1,16], index: 10, kind: input, shape index: {}]   ;;  %s2825_s11 = inlined_call_operand.vmem [shape: f32[16,1], index: 11, kind: input, shape index: {}]   ;;  %s2826_s12 = inlined_call_operand.<no memory space> [shape: f32[1], index: 12, kind: input, shape index: {}]   ;;  %s2827_s13 = inlined_call_operand.vmem [shape: f32[2,1], index: 13, kind: output, shape index: {}]  }
   0x1   :  { %18 = sst [smem:[#allocation3]] %s2820_s6 }
   0x2   :  { %19 = sst [smem:[#allocation4]] %s2826_s12 }
   0x3   :  { %s2434_s29 = smov 0   ;;  %s2436_s30 = smov 0  }
   0x4   :  { %s2438_s14 = smov 0   ;;  %s2440_s15 = smov 0  }
   0x5   :  { %s2442_s16 = smov 0  }
   0x6 LB: > { %s34_s6 = sadd.s32 1, %s2342_s15  ;;  %p53_p1 = scmp.ne.s32.totalorder %s2334_s30, %s2330_s29  ;;  %s2346_s16 = sphi %s2442_s16, %s25_s16   ;;  %s2342_s15 = sphi %s2440_s15, %s2833_s15   ;;  %s2338_s14 = sphi %s2438_s14, %s2832_s14   ;;  %s2334_s30 = sphi %s2436_s30, %s2831_s30   ;;  %s2330_s29 = sphi %s2434_s29, %s2830_s29  }
   0x7   : > { %p35_p0 = scmp.ge.s32.totalorder %s34_s6, 2  ;;  %p54_p2 = scmp.eq.s32.totalorder %s2346_s16, 0 }
   0x8   : > { %s46_s17 = sadd.s32 1, %s2334_s30  ;;  %p1794_p5 = scmp.ge.s32.totalorder %s2346_s16, 2 }
   0x9   : > { %s2835_s6 = smov (%p35_p0, %s34_s6), 0  ;;  %p55_p3 = por %p54_p2, %p53_p1 }
   0xa   : > { %s42_s12 = ssub.s32 %s2342_s15, %s2835_s6  ;;  %421 = sbr.rel (%p1794_p5) target bundleno = 37 (0x25), region = 56 }
   0xb   : > { %p44_p4 = scmp.eq.s32.totalorder %s42_s12, 0 }
   0xd   : > { %s2469_s18 = scalar_select %p44_p4, %s2334_s30, %s46_s17  }
  0x11   : > { %424 = sbr.rel (!%p55_p3) target bundleno = 37 (0x25), region = 60  ;;  %s426_s19 = sand.u32 (%p55_p3), 1, %s2334_s30  }
  0x12   : > { %s1846_s20 = sshll.u32 (%p55_p3), %s2342_s15, 7  ;;  %s1795_s21 = sshll.u32 (%p55_p3), %s426_s19, 8 }
  0x13   : > { %s2477_s24 = scalar_lea.vmem (%p55_p3), %s2814_s0, %s1846_s20  ;;  %s2482_s25 = scalar_lea.vmem (%p55_p3), [#allocation5], %s1795_s21 }
  0x14   : > { %v524_v0 = vld [vmem:[%s2477_s24] sm:$0xff] (%p55_p3)  ;;  %v526_v1 = vld [vmem:[%s2477_s24 + $0x8] sm:$0xff] (%p55_p3)  ;;  %v528_v2 = vld [vmem:[%s2477_s24 + $0x10] sm:$0xff] (%p55_p3) }
  0x15   : > { %525 = vst [vmem:[%s2482_s25] sm:$0xff] (%p55_p3), %v524_v0  ;;  %527 = vst [vmem:[%s2482_s25 + $0x8] sm:$0xff] (%p55_p3), %v526_v1  ;;  %v530_v3 = vld [vmem:[%s2477_s24 + $0x18] sm:$0xff] (%p55_p3)  ;;  %v532_v4 = vld [vmem:[%s2477_s24 + $0x20] sm:$0xff] (%p55_p3) }
  0x16   : > { %529 = vst [vmem:[%s2482_s25 + $0x10] sm:$0xff] (%p55_p3), %v528_v2  ;;  %v534_v5 = vld [vmem:[%s2477_s24 + $0x28] sm:$0xff] (%p55_p3)  ;;  %531 = vst [vmem:[%s2482_s25 + $0x18] sm:$0xff] (%p55_p3), %v530_v3  ;;  %v536_v6 = vld [vmem:[%s2477_s24 + $0x30] sm:$0xff] (%p55_p3) }
  0x17   : > { %533 = vst [vmem:[%s2482_s25 + $0x20] sm:$0xff] (%p55_p3), %v532_v4  ;;  %535 = vst [vmem:[%s2482_s25 + $0x28] sm:$0xff] (%p55_p3), %v534_v5  ;;  %v538_v7 = vld [vmem:[%s2477_s24 + $0x38] sm:$0xff] (%p55_p3)  ;;  %v540_v8 = vld [vmem:[%s2477_s24 + $0x40] sm:$0xff] (%p55_p3) }
  0x18   : > { %537 = vst [vmem:[%s2482_s25 + $0x30] sm:$0xff] %v536_v6  ;;  %539 = vst [vmem:[%s2482_s25 + $0x38] sm:$0xff] %v538_v7  ;;  %v542_v9 = vld [vmem:[%s2477_s24 + $0x48] sm:$0xff]  ;;  %v544_v10 = vld [vmem:[%s2477_s24 + $0x50] sm:$0xff] }
  0x19   : > { %541 = vst [vmem:[%s2482_s25 + $0x40] sm:$0xff] %v540_v8  ;;  %v546_v11 = vld [vmem:[%s2477_s24 + $0x58] sm:$0xff]  ;;  %543 = vst [vmem:[%s2482_s25 + $0x48] sm:$0xff] %v542_v9  ;;  %v548_v12 = vld [vmem:[%s2477_s24 + $0x60] sm:$0xff] }
  0x1a   : > { %545 = vst [vmem:[%s2482_s25 + $0x50] sm:$0xff] %v544_v10  ;;  %547 = vst [vmem:[%s2482_s25 + $0x58] sm:$0xff] %v546_v11  ;;  %v550_v13 = vld [vmem:[%s2477_s24 + $0x68] sm:$0xff]  ;;  %v552_v14 = vld [vmem:[%s2477_s24 + $0x70] sm:$0xff] }
  0x1b   : > { %549 = vst [vmem:[%s2482_s25 + $0x60] sm:$0xff] %v548_v12  ;;  %551 = vst [vmem:[%s2482_s25 + $0x68] sm:$0xff] %v550_v13  ;;  %v554_v15 = vld [vmem:[%s2477_s24 + $0x78] sm:$0xff]  ;;  %v556_v16 = vld [vmem:[%s2477_s24 + $0x100] sm:$0xff] }
  0x1c   : > { %553 = vst [vmem:[%s2482_s25 + $0x70] sm:$0xff] %v552_v14  ;;  %v558_v17 = vld [vmem:[%s2477_s24 + $0x108] sm:$0xff]  ;;  %555 = vst [vmem:[%s2482_s25 + $0x78] sm:$0xff] %v554_v15  ;;  %v560_v18 = vld [vmem:[%s2477_s24 + $0x110] sm:$0xff] }
  0x1d   : > { %557 = vst [vmem:[%s2482_s25 + $0x80] sm:$0xff] %v556_v16  ;;  %559 = vst [vmem:[%s2482_s25 + $0x88] sm:$0xff] %v558_v17  ;;  %v562_v19 = vld [vmem:[%s2477_s24 + $0x118] sm:$0xff]  ;;  %v564_v20 = vld [vmem:[%s2477_s24 + $0x120] sm:$0xff] }
  0x1e   : > { %561 = vst [vmem:[%s2482_s25 + $0x90] sm:$0xff] %v560_v18  ;;  %563 = vst [vmem:[%s2482_s25 + $0x98] sm:$0xff] %v562_v19  ;;  %v566_v21 = vld [vmem:[%s2477_s24 + $0x128] sm:$0xff]  ;;  %v568_v22 = vld [vmem:[%s2477_s24 + $0x130] sm:$0xff] }
  0x1f   : > { %565 = vst [vmem:[%s2482_s25 + $0xa0] sm:$0xff] %v564_v20  ;;  %v570_v23 = vld [vmem:[%s2477_s24 + $0x138] sm:$0xff]  ;;  %567 = vst [vmem:[%s2482_s25 + $0xa8] sm:$0xff] %v566_v21  ;;  %v572_v24 = vld [vmem:[%s2477_s24 + $0x140] sm:$0xff] }
  0x20   : > { %569 = vst [vmem:[%s2482_s25 + $0xb0] sm:$0xff] %v568_v22  ;;  %571 = vst [vmem:[%s2482_s25 + $0xb8] sm:$0xff] %v570_v23  ;;  %v574_v25 = vld [vmem:[%s2477_s24 + $0x148] sm:$0xff]  ;;  %v576_v26 = vld [vmem:[%s2477_s24 + $0x150] sm:$0xff] }
  0x21   : > { %573 = vst [vmem:[%s2482_s25 + $0xc0] sm:$0xff] %v572_v24  ;;  %575 = vst [vmem:[%s2482_s25 + $0xc8] sm:$0xff] %v574_v25  ;;  %v578_v27 = vld [vmem:[%s2477_s24 + $0x158] sm:$0xff]  ;;  %v580_v28 = vld [vmem:[%s2477_s24 + $0x160] sm:$0xff] }
  0x22   : > { %577 = vst [vmem:[%s2482_s25 + $0xd0] sm:$0xff] %v576_v26  ;;  %v582_v29 = vld [vmem:[%s2477_s24 + $0x168] sm:$0xff]  ;;  %579 = vst [vmem:[%s2482_s25 + $0xd8] sm:$0xff] %v578_v27  ;;  %v584_v30 = vld [vmem:[%s2477_s24 + $0x170] sm:$0xff] }
  0x23   : > { %581 = vst [vmem:[%s2482_s25 + $0xe0] sm:$0xff] %v580_v28  ;;  %583 = vst [vmem:[%s2482_s25 + $0xe8] sm:$0xff] %v582_v29  ;;  %v586_v31 = vld [vmem:[%s2477_s24 + $0x178] sm:$0xff] }
  0x24   : > { %585 = vst [vmem:[%s2482_s25 + $0xf0] sm:$0xff] %v584_v30  ;;  %587 = vst [vmem:[%s2482_s25 + $0xf8] sm:$0xff] %v586_v31 }
  0x25 PF: > { %p1798_p6 = scmp.ge.s32.totalorder %s2346_s16, 1  ;;  %p614_p7 = scmp.lt.s32.totalorder %s2346_s16, 3 }
  0x27   : > { %p615_p8 = pnand %p1798_p6, %p614_p7 }
  0x28   : > { %s621_s26 = sand.u32 (!%p615_p8), 1, %s2330_s29   ;;  %p703_p9 = scmp.lt.s32.totalorder (!%p615_p8), %s2338_s14, 1 }
  0x29   : > { %618 = sbr.rel (%p615_p8) target bundleno = 1067 (0x42b), region = 106  ;;  %s1799_s27 = sshll.u32 (!%p615_p8), %s621_s26, 8 }
  0x2a   : > { %s2560_s24 = scalar_lea.vmem (!%p615_p8), [#allocation5], %s1799_s27  ;;  %p1802_p10 = scmp.ne.s32.totalorder (!%p615_p8), %s2338_s14, 0 }
  0x30   : > { %s704_s28 = scalar_select %p703_p9, %s2338_s14, 1 }
  0x31   : > { %724 = sbr.rel (%p1802_p10) target bundleno = 56 (0x38), region = 114  ;;  %vm725_vm0 = vcmask (!%p1802_p10), 256000   ;;  %v2348_v32 = vmov (!%p1802_p10), 0.0  }
  0x32   : > { %s1800_s12 = sshll.u32 %s704_s28, 1  ;;  %726 = vst.msk [vmem:[#allocation2] sm:$0x7] (!%p1802_p10), %vm725_vm0, %v2348_v32  ;;  %727 = vst.msk [vmem:[#allocation2 + $0x4] sm:$0x7] (!%p1802_p10), %vm725_vm0, %v2348_v32 }
  0x33   : > { %s2553_s20 = scalar_lea.vmem %s2817_s3, %s1800_s12  ;;  %s2558_s23 = scalar_lea.vmem %s2818_s4, %s1800_s12 }
  0x38 PF: > { %v765_v33 = vlaneseq  ;;  %v2349_v34 = vmov 1983009808   ;;  %v2350_v36 = vmov 0.0|0.0   ;;  %v728_v37 = vld [vmem:[%s2560_s24] sm:$0xff]  ;;  %v729_v38 = vld [vmem:[%s2560_s24 + $0x8] sm:$0xff]  ;;  %vm866_vm1 = vcmask 261120  }
  0x39   : > { %v763_v35 = vunpack.c.l.s4 %v2349_v34  ;;  %2113 = vmatprep.subr.bf16.mxu0 %v2350_v36  ;;  %2145 = vmatprep.subr.bf16.mxu1 %v2350_v36  ;;  %v2569_v40 = vpack.c.bf16 %v729_v38, %v728_v37  ;;  %v744_v41 = vld [vmem:[%s2560_s24 + $0x80] sm:$0xff]  ;;  %v745_v42 = vld [vmem:[%s2560_s24 + $0x88] sm:$0xff]  ;;  %vm2575_vm2 = vmpackc.low %vm866_vm1, %vm866_vm1  ;;  %vm2351_vm3 = vmmov 0   ;;  %v2352_v48 = vmov 0.0   ;;  %s864_s17 = sld [smem:[#allocation3]]  ;;  %p1837_p11 = scmp.ne.s32.totalorder %s2338_s14, 1 }
  0x3a   : > { %v2567_v39 = vshrl.u32 %v765_v33, 7  ;;  %v2579_v45 = vpack.c.bf16 %v745_v42, %v744_v41  ;;  %v2584_v46 = vld [vmem:[%s2816_s2] sm:$0xf]  ;;  %1965 = vmatprep.mubr.msk.f32.mxu0 %vm2351_vm3, %v2352_v48  ;;  %v730_v50 = vld [vmem:[%s2560_s24 + $0x10] sm:$0xff]  ;;  %vm772_vm4 = vcmask 1041408   ;;  %2000 = vmatprep.mubr.msk.f32.mxu1 %vm2351_vm3, %v2352_v48  ;;  %v732_v1 = vld [vmem:[%s2560_s24 + $0x20] sm:$0xff] }
  0x3b   : > { %v764_v43 = vunpack.c.0.s8 %v763_v35  ;;  %v2589_v47 = vld [vmem:[%s2815_s1] sm:$0xf]  ;;  %2116 = vmatpush3.bf16.xpose.msk.msra.mxu0 %vm2575_vm2, %v2569_v40  ;;  %v746_v52 = vld [vmem:[%s2560_s24 + $0x90] sm:$0xff]  ;;  %v733_v2 = vld [vmem:[%s2560_s24 + $0x28] sm:$0xff]  ;;  %vm1170_vm5 = vcmask 1040384   ;;  %vm1319_vm6 = vcmask 256000  }
  0x3c   : > { %2148 = vmatpush3.bf16.xpose.msk.msra.mxu1 %vm2575_vm2, %v2579_v45  ;;  %2117 = vmatprep.subr.bf16.mxu0 %v2350_v36  ;;  %v731_v51 = vld [vmem:[%s2560_s24 + $0x18] sm:$0xff]  ;;  %v748_v4 = vld [vmem:[%s2560_s24 + $0xa0] sm:$0xff]  ;;  %v749_v5 = vld [vmem:[%s2560_s24 + $0xa8] sm:$0xff]  ;;  %v2634_v6 = vpack.c.bf16 %v733_v2, %v732_v1  ;;  %vm2356_vm7 = vmmov (!%p1837_p11), 0   ;;  %vm1339_vm8 = vcmask (!%p1837_p11), 1041409   ;;  %vm1580_vm9 = vcmask (!%p1837_p11), 130048  }
  0x3d   : > { %v2597_v49 = vsub.s32 %v764_v43, %v2567_v39  ;;  %2149 = vmatprep.subr.bf16.mxu1 %v2350_v36  ;;  %v747_v53 = vld [vmem:[%s2560_s24 + $0x98] sm:$0xff]  ;;  %v2614_v56 = vpack.c.bf16 %v731_v51, %v730_v50  ;;  %v2636_v7 = vpack.c.bf16 %v749_v5, %v748_v4  ;;  %v734_v8 = vld [vmem:[%s2560_s24 + $0x30] sm:$0xff]  ;;  %v736_v14 = vld [vmem:[%s2560_s24 + $0x40] sm:$0xff]  ;;  %s1578_s21 = sld [smem:[#allocation4]] (!%p1837_p11)  ;;  %vm1654_vm10 = vcmask (!%p1837_p11), 1024  }
  0x3e   : > { %v2617_v60 = vpack.c.bf16 %v747_v53, %v746_v52  ;;  %v735_v9 = vld [vmem:[%s2560_s24 + $0x38] sm:$0xff]  ;;  %v750_v10 = vld [vmem:[%s2560_s24 + $0xb0] sm:$0xff]  ;;  %v737_v15 = vld [vmem:[%s2560_s24 + $0x48] sm:$0xff] }
  0x3f   : > { %v820_v54 = vrot.slane %v2584_v46, %v2597_v49  ;;  %v768_v55 = vrot.slane %v2589_v47, %v2597_v49  ;;  %v751_v11 = vld [vmem:[%s2560_s24 + $0xb8] sm:$0xff]  ;;  %v2126_v12 = vpack.c.bf16 %v735_v9, %v734_v8  ;;  %v752_v16 = vld [vmem:[%s2560_s24 + $0xc0] sm:$0xff]  ;;  %v753_v17 = vld [vmem:[%s2560_s24 + $0xc8] sm:$0xff]  ;;  %v2130_v18 = vpack.c.bf16 %v737_v15, %v736_v14 }
  0x40   : > { %v2158_v13 = vpack.c.bf16 %v751_v11, %v750_v10  ;;  %v2162_v19 = vpack.c.bf16 %v753_v17, %v752_v16  ;;  %v738_v20 = vld [vmem:[%s2560_s24 + $0x50] sm:$0xff]  ;;  %v739_v21 = vld [vmem:[%s2560_s24 + $0x58] sm:$0xff]  ;;  %v740_v26 = vld [vmem:[%s2560_s24 + $0x60] sm:$0xff]  ;;  %v2354_v11 = vmov 1966171168  }
  0x41   : > { %v821_v57 = vcombine.high %v820_v54, %v820_v54  ;;  %v824_v58 = vsel %vm772_vm4, %v820_v54, -inf  ;;  %v769_v59 = vcombine.high %v768_v55, %v768_v55  ;;  %v773_v62 = vsel %vm772_vm4, %v768_v55, -inf  ;;  %v754_v22 = vld [vmem:[%s2560_s24 + $0xd0] sm:$0xff]  ;;  %v755_v23 = vld [vmem:[%s2560_s24 + $0xd8] sm:$0xff]  ;;  %v741_v27 = vld [vmem:[%s2560_s24 + $0x68] sm:$0xff] }
  0x42   : > { %v2134_v24 = vpack.c.bf16 %v739_v21, %v738_v20  ;;  %v2166_v25 = vpack.c.bf16 %v755_v23, %v754_v22  ;;  %v756_v28 = vld [vmem:[%s2560_s24 + $0xe0] sm:$0xff]  ;;  %v757_v29 = vld [vmem:[%s2560_s24 + $0xe8] sm:$0xff]  ;;  %v2138_v30 = vpack.c.bf16 %v741_v27, %v740_v26  ;;  %v742_v32 = vld [vmem:[%s2560_s24 + $0x70] sm:$0xff]  ;;  %v1156_v26 = vsub.s32 0, %v2567_v39 }
  0x43   : > { %v825_v61 = vsel %vm772_vm4, %v821_v57, -inf  ;;  %v774_v63 = vsel %vm772_vm4, %v769_v59, -inf  ;;  %2120 = vmatpush3.bf16.xpose.msk.msra.mxu0 %vm2575_vm2, %v2614_v56  ;;  %v2170_v31 = vpack.c.bf16 %v757_v29, %v756_v28  ;;  %v743_v33 = vld [vmem:[%s2560_s24 + $0x78] sm:$0xff]  ;;  %v758_v34 = vld [vmem:[%s2560_s24 + $0xf0] sm:$0xff] }
  0x44   : > { %v826_v0 = vmax.f32 %v824_v58, %v825_v61  ;;  %2152 = vmatpush3.bf16.xpose.msk.msra.mxu1 %vm2575_vm2, %v2617_v60  ;;  %2121 = vmatprep.subr.bf16.mxu0 %v2350_v36  ;;  %v775_v3 = vmax.f32 %v773_v62, %v774_v63  ;;  %v759_v35 = vld [vmem:[%s2560_s24 + $0xf8] sm:$0xff]  ;;  %v2142_v37 = vpack.c.bf16 %v743_v33, %v742_v32 }
  0x45   : > { %2153 = vmatprep.subr.bf16.mxu1 %v2350_v36  ;;  %v2174_v38 = vpack.c.bf16 %v759_v35, %v758_v34  ;;  %v863_v41 = vld [vmem:[%s2819_s5] sm:$0x1] }
  0x46   : > { %827 = vmax.xlane.f32.xlu0 %v826_v0  ;;  %v858_v5 = vld [vmem:[%s2558_s23] sm:$0x3] }
  0x4a   : > { %776 = vmax.xlane.f32.xlu0 %v775_v3 }
  0x4b   : > { %2124 = vmatpush3.bf16.xpose.msk.msra.mxu0 %vm2575_vm2, %v2634_v6 }
  0x4c   : > { %2156 = vmatpush3.bf16.xpose.msk.msra.mxu1 %vm2575_vm2, %v2636_v7  ;;  %2125 = vmatprep.subr.bf16.mxu0 %v2350_v36 }
  0x4d   : > { %2157 = vmatprep.subr.bf16.mxu1 %v2350_v36 }
  0x53   : > { %2128 = vmatpush3.bf16.xpose.msk.msra.mxu0 %vm2575_vm2, %v2126_v12 }
  0x54   : > { %2160 = vmatpush3.bf16.xpose.msk.msra.mxu1 %vm2575_vm2, %v2158_v13  ;;  %2129 = vmatprep.subr.bf16.mxu0 %v2350_v36 }
  0x55   : > { %2161 = vmatprep.subr.bf16.mxu1 %v2350_v36 }
  0x5b   : > { %2132 = vmatpush3.bf16.xpose.msk.msra.mxu0 %vm2575_vm2, %v2130_v18 }
  0x5c   : > { %2164 = vmatpush3.bf16.xpose.msk.msra.mxu1 %vm2575_vm2, %v2162_v19  ;;  %2133 = vmatprep.subr.bf16.mxu0 %v2350_v36 }
  0x5d   : > { %2165 = vmatprep.subr.bf16.mxu1 %v2350_v36 }
  0x63   : > { %2136 = vmatpush3.bf16.xpose.msk.msra.mxu0 %vm2575_vm2, %v2134_v24 }
  0x64   : > { %2168 = vmatpush3.bf16.xpose.msk.msra.mxu1 %vm2575_vm2, %v2166_v25  ;;  %2137 = vmatprep.subr.bf16.mxu0 %v2350_v36 }
  0x65   : > { %2169 = vmatprep.subr.bf16.mxu1 %v2350_v36 }
  0x6b   : > { %2140 = vmatpush3.bf16.xpose.msk.msra.mxu0 %vm2575_vm2, %v2138_v30 }
  0x6c   : > { %2172 = vmatpush3.bf16.xpose.msk.msra.mxu1 %vm2575_vm2, %v2170_v31  ;;  %2141 = vmatprep.subr.bf16.mxu0 %v2350_v36 }
  0x6d   : > { %2173 = vmatprep.subr.bf16.mxu1 %v2350_v36 }
  0x73   : > { %2144 = vmatpush3.bf16.xpose.msk.msra.mxu0 %vm2575_vm2, %v2142_v37 }
  0x74   : > { %2176 = vmatpush3.bf16.xpose.msk.msra.mxu1 %vm2575_vm2, %v2174_v38  ;;  %2177 = vmatprep.subr.bf16.mxu0 %v2350_v36 }
  0x75   : > { %2201 = vmatprep.subr.bf16.mxu1 %v2350_v36 }
  0x7a   : > { %1966 = vmatmul.mubr.msk.f32.vlgmr.msra.gmra.mrb[0].mxu0 %vm866_vm1, %v863_v41 }
  0x7b   : > { %2001 = vmatmul.mubr.msk.f32.vlgmr.msra.gmra.mrb[0].mxu1 %vm866_vm1, %v863_v41  ;;  %2179 = vmatpush3.bf16.msra.mxu0 %v2569_v40  ;;  %v2353_v40 = vmov 269488144  }
  0x7c   : > { %2203 = vmatpush3.bf16.msra.mxu1 %v2579_v45  ;;  %2180 = vmatprep.subr.bf16.mxu0 %v2350_v36  ;;  %v780_v42 = vunpack.c.l.s4 %v2353_v40 }
  0x7d   : > { %2204 = vmatprep.subr.bf16.mxu1 %v2350_v36  ;;  %2035 = vmatprep.mubr.msk.f32.mxu0 %vm2351_vm3, %v2352_v48 }
  0x7e   : > { %2070 = vmatprep.mubr.msk.f32.mxu1 %vm2351_vm3, %v2352_v48  ;;  %v781_v43 = vunpack.c.0.s8 %v780_v42 }
  0x7f   : > { %2182 = vmatpush3.bf16.msra.mxu0 %v2614_v56 }
  0x80   : > { %2206 = vmatpush3.bf16.msra.mxu1 %v2617_v60  ;;  %2183 = vmatprep.subr.bf16.mxu0 %v2350_v36  ;;  %v784_v44 = vsub.s32 %v781_v43, %v2567_v39 }
  0x81   : > { %2207 = vmatprep.subr.bf16.mxu1 %v2350_v36 }
  0x83   : > { %2185 = vmatpush3.bf16.msra.mxu0 %v2634_v6 }
  0x84   : > { %2209 = vmatpush3.bf16.msra.mxu1 %v2636_v7  ;;  %2186 = vmatprep.subr.bf16.mxu0 %v2350_v36  ;;  %v807_v7 = vld [vmem:[%s2553_s20] sm:$0x3] }
  0x85   : > { %2210 = vmatprep.subr.bf16.mxu1 %v2350_v36 }
  0x87   : > { %2188 = vmatpush3.bf16.msra.mxu0 %v2126_v12  ;;  %v1108_v12 = vunpack.c.l.s4 %v2354_v11 }
  0x88   : > { %2212 = vmatpush3.bf16.msra.mxu1 %v2158_v13  ;;  %2189 = vmatprep.subr.bf16.mxu0 %v2350_v36 }
  0x89   : > { %2213 = vmatprep.subr.bf16.mxu1 %v2350_v36  ;;  %v1109_v14 = vunpack.c.0.s8 %v1108_v12 }
  0x8b   : > { %2191 = vmatpush3.bf16.msra.mxu0 %v2130_v18  ;;  %v1112_v16 = vsub.s32 %v1109_v14, %v2567_v39  ;;  %v1175_v39 = vld [vmem:[#allocation2] sm:$0x7] }
  0x8c   : > { %2215 = vmatpush3.bf16.msra.mxu1 %v2162_v19  ;;  %2192 = vmatprep.subr.bf16.mxu0 %v2350_v36  ;;  %v865_v19 = vstv %s864_s17 }
  0x8d   : > { %2216 = vmatprep.subr.bf16.mxu1 %v2350_v36 }
  0x8f   : > { %2194 = vmatpush3.bf16.msra.mxu0 %v2134_v24 }
  0x90   : > { %2218 = vmatpush3.bf16.msra.mxu1 %v2166_v25  ;;  %2195 = vmatprep.subr.bf16.mxu0 %v2350_v36 }
  0x91   : > { %2219 = vmatprep.subr.bf16.mxu1 %v2350_v36 }
  0x93   : > { %2197 = vmatpush3.bf16.msra.mxu0 %v2138_v30 }
  0x94   : > { %2221 = vmatpush3.bf16.msra.mxu1 %v2170_v31  ;;  %2198 = vmatprep.subr.bf16.mxu0 %v2350_v36 }
  0x95   : > { %2222 = vmatprep.subr.bf16.mxu1 %v2350_v36 }
  0x97   : > { %2200 = vmatpush3.bf16.msra.mxu0 %v2142_v37 }
  0x98   : > { %2224 = vmatpush3.bf16.msra.mxu1 %v2174_v38 }
  0xd3   : > { %v828_v45 = vpop.xlane.xlu0 %827 }
  0xd4   : > { %v836_v48 = vrot.slane %v828_v45, %v784_v44  ;;  %v859_v6 = vsub.f32 %v858_v5, %v828_v45  ;;  %v1176_v45 = vld [vmem:[#allocation2 + $0x4] sm:$0x7] }
  0xd5   : > { %v1487_v5 = vld [vmem:[%s2823_s9] sm:$0xff] (!%p1837_p11) }
  0xd6   : > { %v838_v50 = vsub.f32 %v2584_v46, %v836_v48  ;;  %v860_v8 = vmul.f32 1.442695, %v859_v6  ;;  %v1488_v6 = vld [vmem:[%s2823_s9 + $0x8] sm:$0xff] (!%p1837_p11) }
  0xd7   : > { %v777_v51 = vpop.xlane.xlu0 %776 }
  0xd8   : > { %v839_v52 = vmul.f32 1.442695, %v838_v50  ;;  %v785_v53 = vrot.slane %v777_v51, %v784_v44  ;;  %v808_v9 = vsub.f32 %v807_v7, %v777_v51 }
  0xda   : > { %2296 = vpow2.f32 %v839_v52  ;;  %v787_v54 = vsub.f32 %v2589_v47, %v785_v53 }
  0xdc   : > { %v788_v55 = vmul.f32 1.442695, %v787_v54  ;;  %v1332_v54 = vld [vmem:[%s2822_s8] sm:$0xff] (!%p1837_p11) }
  0xde   : > { %2298 = vpow2.f32 %v788_v55  ;;  %v1333_v55 = vld [vmem:[%s2822_s8 + $0x8] sm:$0xff] (!%p1837_p11) }
  0xdf   : > { %2300 = vpow2.f32 %v860_v8  ;;  %v2238_v8 = vpack.c.bf16 (!%p1837_p11), %v1488_v6, %v1487_v5 }
  0xe4   : > { %v2297_v36 = vpop.eup %2296 }
  0xe5   : > { %v848_v56 = vrot.slane %v2297_v36, %v2597_v49  ;;  %v1328_v36 = vld [vmem:[%s2821_s7] sm:$0xff] (!%p1837_p11) }
  0xe7   : > { %v849_v57 = vcombine.high %v848_v56, %v848_v56  ;;  %v852_v59 = vsel %vm772_vm4, %v848_v56, 0.0  ;;  %v2355_v56 = vmov (!%p1837_p11), 0.0|0.0  }
  0xe8   : > { %v2299_v58 = vpop.eup %2298  ;;  %2225 = vmatprep.subr.bf16.mxu0 (!%p1837_p11), %v2355_v56  ;;  %2231 = vmatprep.subr.bf16.mxu1 (!%p1837_p11), %v2355_v56 }
  0xe9   : > { %v853_v60 = vsel %vm772_vm4, %v849_v57, 0.0  ;;  %v797_v46 = vrot.slane %v2299_v58, %v2597_v49  ;;  %v809_v49 = vmul.f32 1.442695, %v808_v9  ;;  %v2301_v15 = vpop.eup %2300  ;;  %v2226_v57 = vpack.c.bf16 (!%p1837_p11), %v1333_v55, %v1332_v54  ;;  %v1329_v58 = vld [vmem:[%s2821_s7 + $0x8] sm:$0xff] (!%p1837_p11) }
  0xea   : > { %v854_v61 = vadd.f32 %v853_v60, %v852_v59  ;;  %v1334_v59 = vld [vmem:[%s2822_s8 + $0x10] sm:$0xff] (!%p1837_p11)  ;;  %v1335_v60 = vld [vmem:[%s2822_s8 + $0x18] sm:$0xff] (!%p1837_p11) }
  0xeb   : > { %v798_v62 = vcombine.high %v797_v46, %v797_v46  ;;  %v801_v47 = vsel %vm772_vm4, %v797_v46, 0.0  ;;  %v2232_v46 = vpack.c.bf16 (!%p1837_p11), %v1329_v58, %v1328_v36 }
  0xec   : > { %855 = vadd.xlane.f32.xlu1 %v854_v61  ;;  %v1330_v61 = vld [vmem:[%s2821_s7 + $0x10] sm:$0xff] (!%p1837_p11) }
  0xed   : > { %v802_v63 = vsel %vm772_vm4, %v798_v62, 0.0  ;;  %v1331_v62 = vld [vmem:[%s2821_s7 + $0x18] sm:$0xff] (!%p1837_p11) }
  0xee   : > { %v803_v0 = vadd.f32 %v802_v63, %v801_v47  ;;  %v2357_v47 = vmov (!%p1837_p11), 0.0  }
  0xf0   : > { %804 = vadd.xlane.f32.xlu1 %v803_v0  ;;  %v2229_v0 = vpack.c.bf16 (!%p1837_p11), %v1335_v60, %v1334_v59 }
 0x14d   : > { %v984_v1 = vpop.f32.mrb[0].mxu0 }
 0x14e   : > { %v1102_v2 = vpop.f32.mrb[0].mxu1  ;;  %v1967_v3 = vpop.f32.mrb[1].mxu0  ;;  %v985_v23 = vadd.f32 %v984_v1, %v865_v19 }
 0x14f   : > { %v2002_v4 = vpop.f32.mrb[1].mxu1  ;;  %v1103_v28 = vadd.f32 %v1102_v2, %v865_v19  ;;  %v2235_v3 = vpack.c.bf16 (!%p1837_p11), %v1331_v62, %v1330_v61 }
 0x150   : > { %v1166_v31 = vrot.slane %v985_v23, 6 }
 0x151   : > { %v1167_v35 = vrot.slane %v1103_v28, 6 }
 0x179   : > { %v856_v10 = vpop.xlane.xlu1 %855 }
 0x17a   : > { %2302 = vrcp.f32 %v856_v10  ;;  %v1490_v10 = vld [vmem:[%s2823_s9 + $0x18] sm:$0xff] (!%p1837_p11) }
 0x17b   : > { %2304 = vpow2.f32 %v809_v49  ;;  %v1489_v49 = vld [vmem:[%s2823_s9 + $0x10] sm:$0xff] (!%p1837_p11) }
 0x17c   : > { %v2241_v12 = vpack.c.bf16 (!%p1837_p11), %v1490_v10, %v1489_v49 }
 0x17d   : > { %v805_v13 = vpop.xlane.xlu1 %804 }
 0x17e   : > { %2306 = vrcp.f32 %v805_v13 }
 0x184   : > { %v2303_v17 = vpop.eup %2302 }
 0x185   : > { %v862_v18 = vmul.f32 %v2303_v17, %v2301_v15  ;;  %v2305_v20 = vpop.eup %2304  ;;  %v1576_v15 = vld [vmem:[%s2825_s11] sm:$0xff] (!%p1837_p11) }
 0x187   : > { %v1138_v21 = vrot.slane %v862_v18, %v1112_v16 }
 0x188   : > { %v2307_v22 = vpop.eup %2306 }
 0x189   : > { %v811_v24 = vmul.f32 %v2307_v22, %v2305_v20  ;;  %v1146_v25 = vrot.slane %v1138_v21, %v1112_v16  ;;  %v1139_v27 = vcombine.high %v1138_v21, %v1138_v21 }
 0x18b   : > { %v1113_v29 = vrot.slane %v811_v24, %v1112_v16  ;;  %v1153_v30 = vrot.slane %v1139_v27, %v1112_v16  ;;  %v1157_v33 = vrot.slane %v1146_v25, %v1156_v26  ;;  %v1841_v24 = vld [vmem:[%s2824_s10] ss:$0 sm:$0xff] (!%p1837_p11) }
 0x18d   : > { %v1121_v32 = vrot.slane %v1113_v29, %v1112_v16  ;;  %v1114_v34 = vcombine.high %v1113_v29, %v1113_v29  ;;  %v1161_v41 = vrot.slane %v1153_v30, %v1156_v26  ;;  %v1579_v29 = vstv (!%p1837_p11), %s1578_s21 }
 0x18f   : > { %v1171_v37 = vsel %vm1170_vm5, %v1121_v32, %v1157_v33  ;;  %v1128_v38 = vrot.slane %v1114_v34, %v1112_v16  ;;  %v1577_v16 = vld [vmem:[%s2825_s11 + $0x8] sm:$0xff] (!%p1837_p11) }
 0x190   : > { %v1173_v40 = vsel %vm772_vm4, %v1171_v37, %v1166_v31  ;;  %v2244_v17 = vpack.c.bf16 (!%p1837_p11), %v1577_v16, %v1576_v15 }
 0x191   : > { %2036 = vmatmul.mubr.f32.vlgmr.msra.gmra.mrb[2].mxu0 %v1173_v40  ;;  %v1172_v42 = vsel %vm1170_vm5, %v1128_v38, %v1161_v41 }
 0x192   : > { %v1174_v43 = vsel %vm772_vm4, %v1172_v42, %v1167_v35  ;;  %2081 = vmatprep.mubr.msk.f32.mxu0 (!%p1837_p11), %vm2356_vm7, %v2357_v47  ;;  %2227 = vmatpush3.bf16.msra.mxu0 (!%p1837_p11), %v2226_v57 }
 0x193   : > { %2071 = vmatmul.mubr.f32.vlgmr.msra.gmra.mrb[2].mxu1 %v1174_v43  ;;  %2228 = vmatprep.subr.bf16.mxu0 (!%p1837_p11), %v2355_v56 }
 0x194   : > { %2092 = vmatprep.mubr.msk.f32.mxu1 (!%p1837_p11), %vm2356_vm7, %v2357_v47  ;;  %2233 = vmatpush3.bf16.msra.mxu1 (!%p1837_p11), %v2232_v46 }
 0x195   : > { %2234 = vmatprep.subr.bf16.mxu1 (!%p1837_p11), %v2355_v56 }
 0x196   : > { %2230 = vmatpush3.bf16.msra.mxu0 (!%p1837_p11), %v2229_v0 }
 0x197   : > { %2237 = vmatprep.subr.bf16.mxu0 (!%p1837_p11), %v2355_v56 }
 0x198   : > { %2236 = vmatpush3.bf16.msra.mxu1 (!%p1837_p11), %v2235_v3 }
 0x199   : > { %2243 = vmatprep.subr.bf16.mxu1 (!%p1837_p11), %v2355_v56 }
 0x263   : > { %1325 = sbr.rel (%p1837_p11) target bundleno = 1067 (0x42b), region = 118 }
 0x264   : > { %v1243_v44 = vpop.f32.mrb[2].mxu0 }
 0x265   : > { %v1317_v48 = vadd.f32 %v1243_v44, %v1175_v39  ;;  %v2037_v50 = vpop.f32.mrb[3].mxu0 }
 0x266   : > { %v1313_v51 = vpop.f32.mrb[2].mxu1 }
 0x267   : > { %1320 = vst.msk [vmem:[#allocation2] sm:$0x7] %vm1319_vm6, %v1317_v48  ;;  %v1318_v52 = vadd.f32 %v1313_v51, %v1176_v45  ;;  %v2072_v53 = vpop.f32.mrb[3].mxu1 }
 0x269   : > { %1321 = vst.msk [vmem:[#allocation2 + $0x4] sm:$0x7] %vm1319_vm6, %v1318_v52 }
 0x26e   : > { %v1326_v63 = vld [vmem:[#allocation2] sm:$0x7] }
 0x26f   : > { %v1338_v2 = vrot.slane %v1326_v63, 1  ;;  %v1491_v13 = vrot.slane %v1326_v63, 2 }
 0x270   : > { %v1327_v1 = vld [vmem:[#allocation2 + $0x4] sm:$0x7] }
 0x271   : > { %v1413_v4 = vrot.slane %v1327_v1, 7  ;;  %v1340_v7 = vsel %vm1339_vm8, %v1327_v1, %v1338_v2  ;;  %v1492_v11 = vrot.slane %v1327_v1, 1 }
 0x272   : > { %2082 = vmatmul.mubr.msk.f32.vlgmr.msra.gmra.mrb[0].mxu0 %vm866_vm1, %v1340_v7 }
 0x273   : > { %v1414_v9 = vsel %vm1339_vm8, %v1413_v4, %v1326_v63  ;;  %2239 = vmatpush3.bf16.msra.mxu0 %v2238_v8  ;;  %2103 = vmatprep.mubr.msk.f32.mxu0 %vm2356_vm7, %v2357_v47  ;;  %v1493_v14 = vsel %vm1339_vm8, %v1492_v11, %v1491_v13 }
 0x274   : > { %2093 = vmatmul.mubr.msk.f32.vlgmr.msra.gmra.mrb[0].mxu1 %vm866_vm1, %v1414_v9  ;;  %2240 = vmatprep.subr.bf16.mxu0 %v2355_v56 }
 0x275   : > { %2110 = vmatprep.mubr.msk.f32.mxu1 %vm2356_vm7, %v2357_v47  ;;  %2245 = vmatpush3.bf16.msra.mxu1 %v2244_v17 }
 0x277   : > { %2242 = vmatpush3.bf16.msra.mxu0 %v2241_v12 }
 0x27a   : > { %2104 = vmatmul.mubr.msk.f32.vlgmr.msra.gmra.mrb[2].mxu0 %vm866_vm1, %v1493_v14 }
 0x345   : > { %v1409_v18 = vpop.f32.mrb[0].mxu0 }
 0x346   : > { %v2083_v19 = vpop.f32.mrb[1].mxu0 }
 0x347   : > { %v1483_v20 = vpop.f32.mrb[0].mxu1 }
 0x348   : > { %v1484_v21 = vadd.f32 %v1483_v20, %v1409_v18  ;;  %v2094_v22 = vpop.f32.mrb[1].mxu1 }
 0x34d   : > { %v1562_v23 = vpop.f32.mrb[2].mxu0 }
 0x34e   : > { %v1566_v25 = vadd.f32 %v1562_v23, %v1484_v21  ;;  %v2105_v26 = vpop.f32.mrb[3].mxu0 }
 0x350   : > { %v1574_v27 = vadd.f32 %v1841_v24, %v1566_v25 }
 0x352   : > { %v1575_v28 = vmax.f32 %v1574_v27, 0.0 }
 0x354   : > { %2111 = vmatmul.mubr.msk.f32.vlgmr.msra.gmra.mrb[2].mxu1 %vm1580_vm9, %v1575_v28 }
 0x427   : > { %v1650_v30 = vpop.f32.mrb[2].mxu1 }
 0x428   : > { %v1651_v31 = vadd.f32 %v1650_v30, %v1579_v29  ;;  %v2112_v32 = vpop.f32.mrb[3].mxu1 }
 0x42a   : > { %1655 = vst.msk [vmem:[%s2827_s13] sm:$0x3] %vm1654_vm10, %v1651_v31 }
 0x42b PF: > { %s25_s16 = sadd.s32 1, %s2346_s16   ;;  %s2830_s29 = smov %s2334_s30 }
 0x42c   : > { %p22_p12 = scmp.ge.s32.totalorder %s25_s16, 4   ;;  %s2831_s30 = smov %s2469_s18 }
 0x42d   : > { %s2832_s14 = smov %s2342_s15  ;;  %s2833_s15 = smov %s2835_s6 }
 0x42e   :  { %24 = sbr.rel (!%p22_p12) target bundleno = 6 (0x6), region = 165 }

</bundles_post_ra>
